<compile_context>
chip_gen: v5e
topology: v5e:2x2
jax: 0.10.0
libtpu: 0.0.40
codegen_flags: <defaults>
</compile_context>

<pallas_src>
import jax
import jax.numpy as jnp
import numpy as np
from jax.experimental import pallas as pl
from jax.experimental.pallas import tpu as pltpu

POS_CH = 4                       # "position" channels consumed by layer_list[0]
OUT_CHANNEL = (8, 16, 32)        # MotionBlock out_channel
EMBEDDING_DIM = POS_CH           # must be 4 for the forward pass to typecheck
BN_EPS = 1e-5
LANE = 128
MAX_TILE = 16384                 # lane-axis pixel tile cap (multiple of 128); v5e may prefer 8192
VMEM_LIMIT_BYTES = 48 * 1024 * 1024   # explicit scoped-VMEM limit; < v7x 64 MiB physical


def motion_block_kernel(x_ref, w12_ref, b12_ref, w2_ref, b2_ref, o_ref):
    # x_ref: (C_in=12, tile_n) f32 -- channels on sublane, pixels on lane (lane-dense I/O).
    # Cast once to bf16 so both matmuls are single-pass on the MXU (f32 accumulation).
    x = x_ref[...].astype(jnp.bfloat16)

    # Fused stage 1: [pos 4->32 ; feat 8->16] in a single MXU matmul.
    y = jnp.dot(w12_ref[...], x, preferred_element_type=jnp.float32)      # (48, tile_n) f32
    y = jnp.maximum(y + b12_ref[...], 0.0)
    pos = y[:OUT_CHANNEL[-1], :]                                          # (32, tile_n)
    f = y[OUT_CHANNEL[-1]:, :].astype(jnp.bfloat16)                       # (16, tile_n)

    # Stage 2: feat 16->32.
    f = jnp.dot(w2_ref[...], f, preferred_element_type=jnp.float32)       # (32, tile_n) f32
    f = jnp.maximum(f + b2_ref[...], 0.0)

    o_ref[...] = (pos * f).astype(o_ref.dtype)


def make_layer_params(key, c_in, c_out):
    """Conv1x1 + BatchNorm (inference) params with BN folded into weight & bias."""
    k_w, k_b, k_g, k_be = jax.random.split(key, 4)
    bound = 1.0 / np.sqrt(c_in)
    w_conv = jax.random.uniform(k_w, (c_out, c_in), jnp.float32, -bound, bound)
    b_conv = jax.random.uniform(k_b, (c_out,), jnp.float32, -bound, bound)
    gamma = 1.0 + 0.1 * jax.random.normal(k_g, (c_out,), jnp.float32)
    beta = 0.1 * jax.random.normal(k_be, (c_out,), jnp.float32)
    running_mean = jnp.zeros((c_out,), jnp.float32)
    running_var = jnp.ones((c_out,), jnp.float32)

    scale = gamma / jnp.sqrt(running_var + BN_EPS)
    w_eff = w_conv * scale[:, None]                  # fold BN scale into the weight
    b_eff = (b_conv - running_mean) * scale + beta   # fold conv bias + BN shift
    return w_eff, b_eff                              # (c_out, c_in), (c_out,)


def pack_params(params):
    """Build the fused (48,12) first-stage weight (bf16) and f32 column biases."""
    (wp, bp), (w1, b1), (w2, b2) = params
    c_mid = OUT_CHANNEL[1]                 # 16
    c_out = OUT_CHANNEL[-1]                # 32
    c_in = EMBEDDING_DIM + OUT_CHANNEL[0]  # 12

    w12 = jnp.zeros((c_out + c_mid, c_in), jnp.float32)
    w12 = w12.at[:c_out, :EMBEDDING_DIM].set(wp)       # pos:  channels 0..3  -> rows 0..31
    w12 = w12.at[c_out:, EMBEDDING_DIM:].set(w1)       # feat: channels 4..11 -> rows 32..47
    b12 = jnp.concatenate([bp, b1]).reshape(c_out + c_mid, 1)
    return (w12.astype(jnp.bfloat16), b12,
            w2.astype(jnp.bfloat16), b2.reshape(c_out, 1))


def _choose_tile(batch, hw, max_tile):
    """Lane-dense pixel tile: multiple of 128 unless it spans the whole pixel axis."""
    tile = hw if hw <= max_tile else max_tile
    # v7x megacore: guarantee >= 2 grid points when B == 1 (both TCs get work).
    if batch == 1 and tile == hw and hw >= 2 * LANE:
        tile = pl.cdiv(pl.cdiv(hw, 2), LANE) * LANE
    return tile


def motion_block_forward(x_nchw, params, *, max_tile=MAX_TILE):
    """x_nchw: (B, 4 + out_channel[0], H, W) f32 -> (B, out_channel[-1], H, W) f32."""
    B, C, H, W = x_nchw.shape
    assert C == POS_CH + OUT_CHANNEL[0]
    c_out = OUT_CHANNEL[-1]
    HW = H * W

    # Free reshape only (no transposes): channels stay leading.
    x3d = x_nchw.reshape(B, C, HW)

    tile_n = _choose_tile(B, HW, max_tile)
    grid = (B, pl.cdiv(HW, tile_n))        # ragged last block handled by Pallas (no pad/slice)

    w12, b12, w2, b2 = pack_params(params)

    def _full(arr):
        return pl.BlockSpec(arr.shape, lambda b, j: (0,) * arr.ndim)

    flops = 2 * B * HW * (EMBEDDING_DIM * c_out
                          + OUT_CHANNEL[0] * OUT_CHANNEL[1]
                          + OUT_CHANNEL[1] * OUT_CHANNEL[2])
    bytes_accessed = B * HW * (C + c_out) * 4

    out3d = pl.pallas_call(
        motion_block_kernel,
        out_shape=jax.ShapeDtypeStruct((B, c_out, HW), jnp.float32),
        grid_spec=pltpu.PrefetchScalarGridSpec(
            num_scalar_prefetch=0,
            grid=grid,
            in_specs=[pl.BlockSpec((None, C, tile_n), lambda b, j: (b, 0, j)),
                      _full(w12), _full(b12), _full(w2), _full(b2)],
            out_specs=pl.BlockSpec((None, c_out, tile_n), lambda b, j: (b, 0, j)),
        ),
        compiler_params=pltpu.CompilerParams(
            dimension_semantics=("parallel", "parallel"),
            vmem_limit_bytes=VMEM_LIMIT_BYTES),
        cost_estimate=pl.CostEstimate(
            flops=flops, transcendentals=0, bytes_accessed=bytes_accessed),
    )(x3d, w12, b12, w2, b2)

    return out3d.reshape(B, c_out, H, W)


def reference_forward(x_nchw, params):
    """Pure-JAX f32 reference in NCHW with the same folded parameters."""
    (wp, bp), (w1, b1), (w2, b2) = params
    pos = jax.nn.relu(jnp.einsum('oc,bchw->bohw', wp, x_nchw[:, :POS_CH])
                      + bp[None, :, None, None])
    f = x_nchw[:, POS_CH:]
    f = jax.nn.relu(jnp.einsum('oc,bchw->bohw', w1, f) + b1[None, :, None, None])
    f = jax.nn.relu(jnp.einsum('oc,bchw->bohw', w2, f) + b2[None, :, None, None])
    return pos * f


if __name__ == "__main__":
    key = jax.random.PRNGKey(0)
    k_x, k_p0, k_p1, k_p2 = jax.random.split(key, 4)

    B, H, W = 2, 16, 16
    c_in_total = POS_CH + OUT_CHANNEL[0]                      # 4 + 8 = 12
    x = jax.random.normal(k_x, (B, c_in_total, H, W), jnp.float32)

    params = (
        make_layer_params(k_p0, EMBEDDING_DIM, OUT_CHANNEL[-1]),   # layer_list[0]: 4 -> 32
        make_layer_params(k_p1, OUT_CHANNEL[0], OUT_CHANNEL[1]),   # layer_list[1]: 8 -> 16
        make_layer_params(k_p2, OUT_CHANNEL[1], OUT_CHANNEL[2]),   # layer_list[2]: 16 -> 32
    )

    out = jax.block_until_ready(motion_block_forward(x, params))
    ref = jax.block_until_ready(reference_forward(x, params))

    assert out.shape == (B, OUT_CHANNEL[-1], H, W)
    # bf16 MXU operands (K = 12 / 16 contractions) vs f32 reference -> relaxed tolerance.
    np.testing.assert_allclose(np.asarray(out), np.asarray(ref), rtol=2e-2, atol=2e-2)

    print("KERNEL_OK")
</pallas_src>

<mosaic_0001>
module attributes {stable_mosaic.version = 11 : i64} {
  func.func @motion_block_kernel(%arg0: i32, %arg1: i32, %arg2: memref<1x12x256xf32, #tpu.memory_space<vmem>>, %arg3: memref<48x12xbf16, #tpu.memory_space<vmem>>, %arg4: memref<48x1xf32, #tpu.memory_space<vmem>>, %arg5: memref<32x16xbf16, #tpu.memory_space<vmem>>, %arg6: memref<32x1xf32, #tpu.memory_space<vmem>>, %arg7: memref<1x32x256xf32, #tpu.memory_space<vmem>>) attributes {dimension_semantics = [#tpu.dimension_semantics<parallel>, #tpu.dimension_semantics<parallel>], iteration_bounds = array<i64: 2, 1>, scalar_prefetch = 0 : i64, scratch_operands = 0 : i64, tpu.core_type = #tpu.core_type<tc>, window_params = [{transform_indices = @transform_0, window_bounds = array<i64: 1, 12, 256>}, {pipeline_mode = #tpu.pipeline_mode<synchronous>, transform_indices = @transform_1, window_bounds = array<i64: 48, 12>}, {pipeline_mode = #tpu.pipeline_mode<synchronous>, transform_indices = @transform_2, window_bounds = array<i64: 48, 1>}, {pipeline_mode = #tpu.pipeline_mode<synchronous>, transform_indices = @transform_3, window_bounds = array<i64: 32, 16>}, {pipeline_mode = #tpu.pipeline_mode<synchronous>, transform_indices = @transform_4, window_bounds = array<i64: 32, 1>}, {transform_indices = @transform_5, window_bounds = array<i64: 1, 32, 256>}]} {
    %c0 = arith.constant 0 : index
    %c0_0 = arith.constant 0 : index
    %c0_1 = arith.constant 0 : index
    %0 = vector.load %arg2[%c0, %c0_0, %c0_1] : memref<1x12x256xf32, #tpu.memory_space<vmem>>, vector<1x12x256xf32>
    %1 = vector.shape_cast %0 : vector<1x12x256xf32> to vector<12x256xf32>
    %2 = arith.truncf %1 : vector<12x256xf32> to vector<12x256xbf16>
    %c0_2 = arith.constant 0 : index
    %c0_3 = arith.constant 0 : index
    %3 = vector.load %arg3[%c0_2, %c0_3] : memref<48x12xbf16, #tpu.memory_space<vmem>>, vector<48x12xbf16>
    %cst = arith.constant dense<0.000000e+00> : vector<48x256xf32>
    %4 = tpu.matmul %3, %2, %cst {dimension_numbers = #tpu.dot_dimension_numbers<[1], [0], [0], [1], [0, 0, 1, 1], [], []>} : vector<48x12xbf16>, vector<12x256xbf16>, vector<48x256xf32> -> vector<48x256xf32>
    %c0_4 = arith.constant 0 : index
    %c0_5 = arith.constant 0 : index
    %5 = vector.load %arg4[%c0_4, %c0_5] : memref<48x1xf32, #tpu.memory_space<vmem>>, vector<48x1xf32>
    %6 = vector.broadcast %5 : vector<48x1xf32> to vector<48x256xf32>
    %7 = arith.addf %4, %6 : vector<48x256xf32>
    %cst_6 = arith.constant 0.000000e+00 : f32
    %8 = vector.broadcast %cst_6 : f32 to vector<48x256xf32>
    %9 = arith.maximumf %7, %8 : vector<48x256xf32>
    %10 = vector.extract_strided_slice %9 {offsets = [0, 0], sizes = [32, 256], strides = [1, 1]} : vector<48x256xf32> to vector<32x256xf32>
    %11 = vector.extract_strided_slice %9 {offsets = [32, 0], sizes = [16, 256], strides = [1, 1]} : vector<48x256xf32> to vector<16x256xf32>
    %12 = arith.truncf %11 : vector<16x256xf32> to vector<16x256xbf16>
    %c0_7 = arith.constant 0 : index
    %c0_8 = arith.constant 0 : index
    %13 = vector.load %arg5[%c0_7, %c0_8] : memref<32x16xbf16, #tpu.memory_space<vmem>>, vector<32x16xbf16>
    %cst_9 = arith.constant dense<0.000000e+00> : vector<32x256xf32>
    %14 = tpu.matmul %13, %12, %cst_9 {dimension_numbers = #tpu.dot_dimension_numbers<[1], [0], [0], [1], [0, 0, 1, 1], [], []>} : vector<32x16xbf16>, vector<16x256xbf16>, vector<32x256xf32> -> vector<32x256xf32>
    %c0_10 = arith.constant 0 : index
    %c0_11 = arith.constant 0 : index
    %15 = vector.load %arg6[%c0_10, %c0_11] : memref<32x1xf32, #tpu.memory_space<vmem>>, vector<32x1xf32>
    %16 = vector.broadcast %15 : vector<32x1xf32> to vector<32x256xf32>
    %17 = arith.addf %14, %16 : vector<32x256xf32>
    %cst_12 = arith.constant 0.000000e+00 : f32
    %18 = vector.broadcast %cst_12 : f32 to vector<32x256xf32>
    %19 = arith.maximumf %17, %18 : vector<32x256xf32>
    %20 = arith.mulf %10, %19 : vector<32x256xf32>
    %c0_13 = arith.constant 0 : index
    %c0_14 = arith.constant 0 : index
    %c0_15 = arith.constant 0 : index
    %21 = vector.load %arg7[%c0_13, %c0_14, %c0_15] : memref<1x32x256xf32, #tpu.memory_space<vmem>>, vector<1x32x256xf32>
    %22 = vector.shape_cast %21 : vector<1x32x256xf32> to vector<32x256xf32>
    %23 = vector.shape_cast %20 : vector<32x256xf32> to vector<1x32x256xf32>
    tpu.vector_store %arg7[%c0_13, %c0_14, %c0_15], %23 {strides = array<i32>} : memref<1x32x256xf32, #tpu.memory_space<vmem>>, vector<1x32x256xf32>,
    return
  }
  func.func @transform_0(%arg0: i32, %arg1: i32) -> (i32, i32, i32) {
    %c0_i32 = arith.constant 0 : i32
    %c0_i32_0 = arith.constant 0 : i32
    return %arg0, %c0_i32, %arg1 : i32, i32, i32
  }
  func.func @transform_1(%arg0: i32, %arg1: i32) -> (i32, i32) {
    %c0_i32 = arith.constant 0 : i32
    %c0_i32_0 = arith.constant 0 : i32
    %c0_i32_1 = arith.constant 0 : i32
    return %c0_i32, %c0_i32_0 : i32, i32
  }
  func.func @transform_2(%arg0: i32, %arg1: i32) -> (i32, i32) {
    %c0_i32 = arith.constant 0 : i32
    %c0_i32_0 = arith.constant 0 : i32
    %c0_i32_1 = arith.constant 0 : i32
    return %c0_i32, %c0_i32_0 : i32, i32
  }
  func.func @transform_3(%arg0: i32, %arg1: i32) -> (i32, i32) {
    %c0_i32 = arith.constant 0 : i32
    %c0_i32_0 = arith.constant 0 : i32
    %c0_i32_1 = arith.constant 0 : i32
    return %c0_i32, %c0_i32_0 : i32, i32
  }
  func.func @transform_4(%arg0: i32, %arg1: i32) -> (i32, i32) {
    %c0_i32 = arith.constant 0 : i32
    %c0_i32_0 = arith.constant 0 : i32
    %c0_i32_1 = arith.constant 0 : i32
    return %c0_i32, %c0_i32_0 : i32, i32
  }
  func.func @transform_5(%arg0: i32, %arg1: i32) -> (i32, i32, i32) {
    %c0_i32 = arith.constant 0 : i32
    %c0_i32_0 = arith.constant 0 : i32
    return %arg0, %c0_i32, %arg1 : i32, i32, i32
  }
}

</mosaic_0001>

<bundles_post_ra>
// kernel: tpu_custom_call.1
= control target key start
LH: loop header
LB: loop body
LE: loop exit
PB: predicated region body
PF: predicated region fallthrough
CT: control target
= control target key end

     0   :  { %10 = vsyncpa [#allocation3], 0  ;;  %s1000_s0 = inlined_call_operand.vmem [shape: f32[2,12,256], index: 0, kind: input, shape index: {}]   ;;  %s1001_s1 = inlined_call_operand.vmem [shape: bf16[48,12], index: 1, kind: input, shape index: {}]   ;;  %s1002_s2 = inlined_call_operand.vmem [shape: f32[48,1], index: 2, kind: input, shape index: {}]   ;;  %s1003_s3 = inlined_call_operand.vmem [shape: bf16[32,16], index: 3, kind: input, shape index: {}]   ;;  %s1004_s4 = inlined_call_operand.vmem [shape: f32[32,1], index: 4, kind: input, shape index: {}]   ;;  %s1005_s5 = inlined_call_operand.hbm [shape: f32[2,32,256], index: 5, kind: output, shape index: {}]  }
   0x1   :  { %12 = vsyncpa [#allocation3 + $0x1], 0  ;;  %s825_s18 = smov 0   ;;  %s827_s19 = smov 0  }
   0x2   :  { %s829_s20 = smov 0   ;;  %s831_s21 = smov 0  }
   0x3   :  { %s833_s22 = smov 0   ;;  %s835_s23 = smov 0  }
   0x4 LB: > { %s601_s24 = sadd.s32 4294967295, %s790_s23   ;;  %s602_s25 = sadd.s32 4294967294, %s790_s23   ;;  %s790_s23 = sphi %s835_s23, %s18_s23   ;;  %s786_s22 = sphi %s833_s22, %s1012_s22   ;;  %s782_s21 = sphi %s831_s21, %s1011_s21   ;;  %s778_s20 = sphi %s829_s20, %s1010_s20   ;;  %s774_s19 = sphi %s827_s19, %s1009_s19   ;;  %s770_s18 = sphi %s825_s18, %s1008_s18  }
   0x5   : > { %s30_s26 = sadd.s32 1, %s786_s22  ;;  %s151_s27 = sadd.s32 1, %s778_s20 }
   0x6   : > { %p32_p0 = scmp.ge.s32.totalorder %s30_s26, 2  ;;  %p161_p1 = scmp.ne.s32.totalorder %s778_s20, %s774_s19 }
   0x7   : > { %p162_p2 = scmp.eq.s32.totalorder %s601_s24, 1  ;;  %p167_p3 = scmp.ne.s32.totalorder %s774_s19, %s770_s18 }
   0x8   : > { %s1014_s26 = smov (%p32_p0, %s30_s26), 0  ;;  %p168_p5 = scmp.eq.s32.totalorder %s602_s25, 1 }
   0x9   : > { %p865_p4 = por %p162_p2, %p161_p1  ;;  %s146_s29 = ssub.s32 %s786_s22, %s1014_s26 }
   0xa   : > { %p605_p6 = scmp.ge.s32.totalorder %s790_s23, 1  ;;  %p149_p7 = scmp.eq.s32.totalorder %s146_s29, 0 }
   0xb   : > { %p872_p8 = por %p168_p5, %p167_p3  ;;  %p211_p9 = scmp.lt.s32.totalorder %s790_s23, 3 }
   0xc   : > { %s878_s6 = scalar_select %p149_p7, %s778_s20, %s151_s27  }
   0xd   : > { %p212_p10 = pnand %p605_p6, %p211_p9 }
   0xe   : > { %p244_p11 = scmp.lt.s32.totalorder (!%p212_p10), %s782_s21, 1  ;;  %s732_s10 = scalar_lea.hbm (!%p212_p10), %s1005_s5, 128 }
   0xf   : > { %215 = sbr.rel (%p212_p10) target bundleno = 373 (0x175), region = 40 }
  0x14   : > { %v267_v0 = vld [vmem:[%s1002_s2] sm:$0xff]  ;;  %v792_v1 = vmov 0   ;;  %s245_s11 = scalar_select %p244_p11, %s782_s21, 1  ;;  %vm328_vm0 = vcmask 1045504   ;;  %v268_v8 = vld [vmem:[%s1002_s2 + $0x8] sm:$0xff]  ;;  %vm318_vm1 = vcmask 97280  }
  0x15   : > { %710 = vset.pattern.permute.xlu1 %v792_v1  ;;  %709 = vset.pattern.permute.xlu0 %v792_v1  ;;  %v271_v2 = vld [vmem:[%s1002_s2 + $0x20] sm:$0xff]  ;;  %v272_v10 = vld [vmem:[%s1002_s2 + $0x28] sm:$0xff]  ;;  %v269_v14 = vld [vmem:[%s1002_s2 + $0x10] sm:$0xff]  ;;  %vm435_vm2 = vcmask 130048  }
  0x16   : > { %275 = vperm.xlu1 %710, %v267_v0   ;;  %295 = vperm.xlu0 %709, %v271_v2   ;;  %s644_s12 = sshll.u32 %s245_s11, 5  ;;  %v645_v12 = vld [vmem:[%s1001_s1] sm:$0xff]  ;;  %v270_v16 = vld [vmem:[%s1002_s2 + $0x18] sm:$0xff]  ;;  %v646_v18 = vld [vmem:[%s1001_s1 + $0x8] sm:$0xff] }
  0x17   : > { %711 = vset.pattern.permute.xlu2 %v792_v1  ;;  %s251_s15 = scalar_lea.vmem %s1000_s0, %s644_s12  ;;  %v401_v15 = vld [vmem:[%s1004_s4] sm:$0xff]  ;;  %v404_v17 = vld [vmem:[%s1004_s4 + $0x18] sm:$0xff]  ;;  %v647_v19 = vld [vmem:[%s1001_s1 + $0x10] sm:$0xff]  ;;  %s240_s12 = sand.u32 1, %s774_s19  }
  0x18   : > { %v255_v3 = vld [vmem:[%s251_s15] sm:$0xff]  ;;  %v257_v4 = vld [vmem:[%s251_s15 + $0x10] sm:$0xf]  ;;  %v256_v5 = vld [vmem:[%s251_s15 + $0x8] sm:$0xff]  ;;  %285 = vperm.xlu2 %711, %v269_v14   ;;  %s606_s13 = sshll.u32 %s240_s12, 6  ;;  %s505_s27 = scalar_lea.sflag [#allocation3], %s240_s12 }
  0x19   : > { %v259_v6 = vpack.c.bf16 %v257_v4, %v255_v3  ;;  %v258_v7 = vld [vmem:[%s251_s15 + $0x18] sm:$0xf]  ;;  %v402_v31 = vld [vmem:[%s1004_s4 + $0x8] sm:$0xff]  ;;  %v403_v32 = vld [vmem:[%s1004_s4 + $0x10] sm:$0xff]  ;;  %s947_s14 = scalar_lea.vmem [#allocation2], %s606_s13  ;;  %s650_s15 = sshll.u32 %s782_s21, 6 }
  0x1a   : > { %v260_v9 = vpack.c.bf16 %v258_v7, %v256_v5  ;;  %v648_v46 = vld [vmem:[%s1003_s3] sm:$0xff]  ;;  %v649_v47 = vld [vmem:[%s1003_s3 + $0x8] sm:$0xff]  ;;  %s518_s24 = scalar_lea.hbm %s1005_s5, %s650_s15  ;;  %s519_s21 = sshll.u32 %s947_s14, 4  ;;  %s520_s21 = int_to_ptr.vmem [resolvable:$true] %s519_s21 }
  0x1b   : > { %v330_v11 = vsel %vm328_vm0, %v259_v6, 0  ;;  %s521_s25 = sshll.u32 %s518_s24, 4  ;;  %s522_s25 = int_to_ptr.hbm [resolvable:$true] %s521_s25 }
  0x1c   : > { %342 = vmatpush.bf16.msra.mxu0 %v330_v11  ;;  %v333_v13 = vsel %vm328_vm0, %v260_v9, 0  ;;  %s726_s29 = sshra.s32 %s522_s25, 4  ;;  %s727_s29 = int_to_ptr.hbm [resolvable:$true] %s726_s29 }
  0x1d   : > { %366 = vmatpush.bf16.msra.mxu1 %v333_v13  ;;  %s728_s7 = scalar_lea.hbm %s727_s29, 64  ;;  %p733_p1 = scmp.lt.s32.totalorder %s727_s29, %s1005_s5 }
  0x1e   : > { %280 = vperm.xlu1 %710, %v268_v8   ;;  %300 = vperm.xlu0 %709, %v272_v10   ;;  %p729_p12 = scmp.ne.s32.totalorder %s727_s29, %s728_s7  ;;  %p734_p2 = scmp.lt.s32.totalorder %s732_s10, %s728_s7 }
  0x1f   : > { %621 = vmatmul.msk.bf16.vlgmr.msra.gmra.mxu0 %vm318_vm1, %v645_v12 }
  0x20   : > { %624 = vmatmul.msk.bf16.vlgmr.msra.gmra.mxu1 %vm318_vm1, %v645_v12  ;;  %290 = vperm.xlu2 %711, %v270_v16   ;;  %p730_p13 = pnand %p729_p12, %p865_p4  ;;  %p735_p3 = por %p734_p2, %p733_p1 }
  0x22   : > { %p731_p0 = pneg %p730_p13 }
  0x24   : > { %p736_p5 = pnand %p735_p3, %p731_p0 }
  0x26   : > { %407 = vperm.xlu0 %709, %v401_v15   ;;  %412 = vperm.xlu1 %710, %v402_v31  }
  0x28   : > { %417 = vperm.xlu2 %711, %v403_v32  }
  0x2e   : > { %422 = vperm.xlu0 %709, %v404_v17  }
  0x2f   : > { %622 = vmatmul.msk.bf16.gmra.mxu0 %vm318_vm1, %v646_v18 }
  0x30   : > { %625 = vmatmul.msk.bf16.gmra.mxu1 %vm318_vm1, %v646_v18 }
  0x3f   : > { %623 = vmatmul.msk.bf16.gmra.mxu0 %vm318_vm1, %v647_v19 }
  0x40   : > { %626 = vmatmul.msk.bf16.gmra.mxu1 %vm318_vm1, %v647_v19 }
  0x72   : > { %v286_v50 = vpop.permute.xlu2 %285 }
  0x7a   : > { %v291_v3 = vpop.permute.xlu2 %290 }
  0x82   : > { %v418_v16 = vpop.permute.xlu2 %417 }
  0x88   : > { %v296_v28 = vpop.permute.xlu0 %295  ;;  %v276_v48 = vpop.permute.xlu1 %275 }
  0x90   : > { %v301_v34 = vpop.permute.xlu0 %300  ;;  %v281_v49 = vpop.permute.xlu1 %280 }
  0x98   : > { %v408_v53 = vpop.permute.xlu0 %407  ;;  %v413_v0 = vpop.permute.xlu1 %412 }
  0x9c   : > { %v344_v20 = vpop.f32.mrf.mxu0 }
  0x9d   : > { %v368_v21 = vpop.f32.mrf.mxu1  ;;  %v345_v51 = vadd.f32 %v344_v20, %v276_v48 }
  0x9e   : > { %v369_v52 = vadd.f32 %v368_v21, %v276_v48 }
  0x9f   : > { %v383_v58 = vmax.f32 %v345_v51, 0.0 }
  0xa0   : > { %v384_v60 = vmax.f32 %v369_v52, 0.0  ;;  %v423_v31 = vpop.permute.xlu0 %422 }
  0xa4   : > { %v346_v22 = vpop.f32.mrf.mxu0 }
  0xa5   : > { %v370_v23 = vpop.f32.mrf.mxu1  ;;  %v347_v1 = vadd.f32 %v346_v22, %v281_v49 }
  0xa6   : > { %v371_v2 = vadd.f32 %v370_v23, %v281_v49 }
  0xa7   : > { %v385_v8 = vmax.f32 %v347_v1, 0.0 }
  0xa8   : > { %v386_v10 = vmax.f32 %v371_v2, 0.0 }
  0xac   : > { %v924_v24 = vpop.f32.mrf.mxu0 }
  0xad   : > { %v926_v25 = vpop.f32.mrf.mxu1  ;;  %v350_v14 = vadd.f32 %v924_v24, %v286_v50 }
  0xae   : > { %v374_v15 = vadd.f32 %v926_v25, %v286_v50 }
  0xaf   : > { %v387_v21 = vmax.f32 %v350_v14, 0.0 }
  0xb0   : > { %v388_v23 = vmax.f32 %v374_v15, 0.0 }
  0xb4   : > { %v928_v26 = vpop.f32.mrf.mxu0 }
  0xb5   : > { %v930_v27 = vpop.f32.mrf.mxu1  ;;  %v352_v24 = vadd.f32 %v928_v26, %v291_v3 }
  0xb6   : > { %v376_v25 = vadd.f32 %v930_v27, %v291_v3 }
  0xb7   : > { %v389_v26 = vmax.f32 %v352_v24, 0.0 }
  0xbc   : > { %v354_v29 = vpop.f32.mrf.mxu0 }
  0xbd   : > { %v378_v30 = vpop.f32.mrf.mxu1  ;;  %v355_v33 = vadd.f32 %v354_v29, %v296_v28 }
  0xbe   : > { %v379_v35 = vadd.f32 %v378_v30, %v296_v28 }
  0xbf   : > { %v391_v40 = vmax.f32 %v355_v33, 0.0 }
  0xc0   : > { %v392_v42 = vmax.f32 %v379_v35, 0.0 }
  0xc4   : > { %v356_v36 = vpop.f32.mrf.mxu0 }
  0xc5   : > { %v357_v37 = vadd.f32 %v356_v36, %v301_v34  ;;  %v380_v38 = vpop.f32.mrf.mxu1 }
  0xc6   : > { %v381_v39 = vadd.f32 %v380_v38, %v301_v34 }
  0xc7   : > { %v393_v41 = vmax.f32 %v357_v37, 0.0  ;;  %v390_v37 = vmax.f32 %v376_v25, 0.0 }
  0xc8   : > { %v394_v43 = vmax.f32 %v381_v39, 0.0 }
  0xc9   : > { %v395_v44 = vpack.c.bf16 %v393_v41, %v391_v40 }
  0xca   : > { %v396_v45 = vpack.c.bf16 %v394_v43, %v392_v42 }
  0xcb   : > { %449 = vmatpush.bf16.msra.mxu2 %v395_v44 }
  0xcc   : > { %468 = vmatpush.bf16.msra.mxu3 %v396_v45 }
  0xce   : > { %635 = vmatmul.msk.bf16.vlgmr.msra.gmra.mxu2 %vm435_vm2, %v648_v46 }
  0xcf   : > { %637 = vmatmul.msk.bf16.vlgmr.msra.gmra.mxu3 %vm435_vm2, %v648_v46 }
  0xde   : > { %636 = vmatmul.msk.bf16.gmra.mxu2 %vm435_vm2, %v649_v47 }
  0xdf   : > { %638 = vmatmul.msk.bf16.gmra.mxu3 %vm435_vm2, %v649_v47 }
 0x151   : > { %v451_v54 = vpop.f32.mrf.mxu2 }
 0x152   : > { %v452_v55 = vadd.f32 %v451_v54, %v408_v53  ;;  %v470_v56 = vpop.f32.mrf.mxu3 }
 0x153   : > { %v471_v57 = vadd.f32 %v470_v56, %v408_v53 }
 0x154   : > { %v480_v59 = vmax.f32 %v452_v55, 0.0 }
 0x155   : > { %v481_v61 = vmax.f32 %v471_v57, 0.0 }
 0x156   : > { %v488_v62 = vmul.f32 %v480_v59, %v383_v58 }
 0x157   : > { %v489_v63 = vmul.f32 %v481_v61, %v384_v60 }
 0x158   : > { %496 = vst [vmem:[%s947_s14] sm:$0xff] %v488_v62 }
 0x159   : > { %497 = vst [vmem:[%s947_s14 + $0x8] sm:$0xff] %v489_v63  ;;  %v453_v4 = vpop.f32.mrf.mxu2 }
 0x15a   : > { %v454_v5 = vadd.f32 %v453_v4, %v413_v0  ;;  %v472_v6 = vpop.f32.mrf.mxu3 }
 0x15b   : > { %v473_v7 = vadd.f32 %v472_v6, %v413_v0 }
 0x15c   : > { %v482_v9 = vmax.f32 %v454_v5, 0.0 }
 0x15d   : > { %v483_v11 = vmax.f32 %v473_v7, 0.0 }
 0x15e   : > { %v490_v12 = vmul.f32 %v482_v9, %v385_v8 }
 0x15f   : > { %v491_v13 = vmul.f32 %v483_v11, %v386_v10 }
 0x160   : > { %498 = vst [vmem:[%s947_s14 + $0x10] sm:$0xff] %v490_v12 }
 0x161   : > { %499 = vst [vmem:[%s947_s14 + $0x18] sm:$0xff] %v491_v13  ;;  %v456_v17 = vpop.f32.mrf.mxu2 }
 0x162   : > { %v457_v18 = vadd.f32 %v456_v17, %v418_v16  ;;  %v475_v19 = vpop.f32.mrf.mxu3 }
 0x163   : > { %v476_v20 = vadd.f32 %v475_v19, %v418_v16 }
 0x164   : > { %v484_v22 = vmax.f32 %v457_v18, 0.0 }
 0x165   : > { %v485_v28 = vmax.f32 %v476_v20, 0.0 }
 0x166   : > { %v492_v29 = vmul.f32 %v484_v22, %v387_v21 }
 0x167   : > { %v493_v30 = vmul.f32 %v485_v28, %v388_v23 }
 0x168   : > { %500 = vst [vmem:[%s947_s14 + $0x20] sm:$0xff] %v492_v29 }
 0x169   : > { %501 = vst [vmem:[%s947_s14 + $0x28] sm:$0xff] %v493_v30  ;;  %v458_v32 = vpop.f32.mrf.mxu2 }
 0x16a   : > { %v459_v33 = vadd.f32 %v458_v32, %v423_v31  ;;  %v477_v34 = vpop.f32.mrf.mxu3 }
 0x16b   : > { %v478_v35 = vadd.f32 %v477_v34, %v423_v31 }
 0x16c   : > { %v486_v36 = vmax.f32 %v459_v33, 0.0 }
 0x16d   : > { %v487_v38 = vmax.f32 %v478_v35, 0.0 }
 0x16e   : > { %v494_v39 = vmul.f32 %v486_v36, %v389_v26 }
 0x16f   : > { %v495_v27 = vmul.f32 %v487_v38, %v390_v37 }
 0x170   : > { %502 = vst [vmem:[%s947_s14 + $0x30] sm:$0xff] %v494_v39 }
 0x171   : > { %503 = vst [vmem:[%s947_s14 + $0x38] sm:$0xff] %v495_v27 }
 0x172   : > { %739 = shalt.err (!%p736_p5)
}
 0x173   : > { %s793_s12 = smov 256   ;;  %s794_s14 = smov 16  }
 0x174   : > { %651 = dma.vmem_to_hbm [thread:$0]  (%p865_p4), %s520_s21, 1024, %s522_s25, %s505_s27, %s793_s12, %s793_s12, %s794_s14  }
 0x175 PF: > { %p657_p6 = scmp.ge.s32.totalorder %s790_s23, 2  ;;  %s536_s15 = sand.u32 1, %s770_s18  }
 0x176   : > { %s537_s16 = scalar_lea.sflag [#allocation3], %s536_s15 }
 0x177   : > { %p654_p7 = pnand %p657_p6, %p872_p8 }
 0x179   : > { %p655_p9 = pneg %p654_p7 }
 0x17b   : > { %765 = dma.done.wait (%p655_p9), %s537_s16, 1024  }
 0x17c   : > { %767 = vsyncadd (%p655_p9), %s537_s16, 4294966272  ;;  %s18_s23 = sadd.s32 1, %s790_s23   ;;  %s1008_s18 = smov %s774_s19 }
 0x17d   : > { %p15_p10 = scmp.ge.s32.totalorder %s18_s23, 4   ;;  %s1009_s19 = smov %s778_s20 }
 0x17e   : > { %s1010_s20 = smov %s878_s6  ;;  %s1011_s21 = smov %s786_s22 }
 0x17f   : > { %s1012_s22 = smov %s1014_s26  ;;  %17 = sbr.rel (!%p15_p10) target bundleno = 4 (0x4), region = 75 }
 0x184   :  { %543 = vsyncpa [#allocation3], 1 }
 0x185   :  { %545 = vsyncpa [#allocation3 + $0x1], 1 }

</bundles_post_ra>
